<compile_context>
chip_gen: v7x
topology: tpu7x:2x2x1
jax: 0.10.0
libtpu: 0.0.40
codegen_flags: <defaults>
</compile_context>

<pallas_src>
import functools

import jax
import jax.numpy as jnp
from jax.experimental import pallas as pl
from jax.experimental.pallas import tpu as pltpu

LANES = 128
SUBLANES = 8
MAX_TILE_ROWS = 2048   # (2048, 128) f32 = 1 MiB / input block; 2 inputs x 2 bufs = 4 MiB VMEM
NUM_SPLITS = 2         # leading "parallel" grid axis (both TCs on v7x; serial elsewhere)


def _dice_kernel(pred_ref, tgt_ref, part_ref, *, tile_rows, valid_rows,
                 steps_per_split, need_mask):
    p = pl.program_id(0)   # parallel split index
    s = pl.program_id(1)   # sequential reduction step within the split

    @pl.when(s == 0)
    def _():
        part_ref[...] = jnp.zeros_like(part_ref)

    o = pred_ref[...].astype(jnp.float32)
    t = tgt_ref[...].astype(jnp.float32)

    if need_mask:
        # Ragged last block / clamped duplicate block: zero out rows past the
        # valid extent (use where, not multiply, so garbage NaN/Inf can't leak).
        start_row = (p * steps_per_split + s) * tile_rows
        local_row = jax.lax.broadcasted_iota(jnp.int32, (tile_rows, LANES), 0)
        valid = (start_row + local_row) < valid_rows
        o = jnp.where(valid, o, 0.0)
        t = jnp.where(valid, t, 0.0)

    # Fold the (tile_rows, 128) tile into a single (8, 128) vreg with VPU adds.
    folds = tile_rows // SUBLANES
    prod = (o * t).reshape(folds, SUBLANES, LANES).sum(axis=0)   # sum(output*target) partial
    both = (o + t).reshape(folds, SUBLANES, LANES).sum(axis=0)   # sum(output)+sum(target) partial

    part_ref[0, :, :] += prod
    part_ref[1, :, :] += both


def dice_loss(output, target, smooth=0.0, eps=1e-07):
    assert output.shape == target.shape
    n = output.size

    pred = output.reshape(-1)
    tgt = target.reshape(-1)

    # Keep native dtype (cast happens in-kernel). Only pad when the element
    # count is not a multiple of one (8, 128) tile.
    chunk = SUBLANES * LANES
    rem = n % chunk
    if rem:
        # TODO(synk): odd tail sizes take a tiny zero-pad (materializes a copy);
        # common shapes (n % 1024 == 0) pass through as a free reshape.
        pad = chunk - rem
        pred = jnp.pad(pred, (0, pad))
        tgt = jnp.pad(tgt, (0, pad))

    rows = pred.shape[0] // LANES            # multiple of 8
    pred2d = pred.reshape(rows, LANES)
    tgt2d = tgt.reshape(rows, LANES)

    tile_rows = min(MAX_TILE_ROWS, rows)     # still a multiple of 8
    nblocks = pl.cdiv(rows, tile_rows)
    steps = pl.cdiv(nblocks, NUM_SPLITS)     # inner reduction steps per split
    need_mask = (NUM_SPLITS * steps * tile_rows) != rows

    def in_map(p, s):
        # Clamp so duplicate / edge blocks stay in-bounds; the row mask zeroes
        # their contribution.
        return (jnp.minimum(p * steps + s, nblocks - 1), 0)

    kernel = functools.partial(
        _dice_kernel,
        tile_rows=tile_rows,
        valid_rows=rows,
        steps_per_split=steps,
        need_mask=need_mask,
    )

    parts = pl.pallas_call(
        kernel,
        out_shape=jax.ShapeDtypeStruct((NUM_SPLITS, 2, SUBLANES, LANES), jnp.float32),
        grid_spec=pltpu.PrefetchScalarGridSpec(
            num_scalar_prefetch=0,
            grid=(NUM_SPLITS, steps),
            in_specs=[
                pl.BlockSpec((tile_rows, LANES), in_map),
                pl.BlockSpec((tile_rows, LANES), in_map),
            ],
            out_specs=pl.BlockSpec((None, 2, SUBLANES, LANES),
                                   lambda p, s: (p, 0, 0, 0)),
        ),
        compiler_params=pltpu.CompilerParams(
            dimension_semantics=("parallel", "arbitrary"),
        ),
    )(pred2d, tgt2d)

    # Tiny epilogue: final cross-lane reduction + scalar arithmetic.
    prod_sum = jnp.sum(parts[:, 0])
    total_sum = jnp.sum(parts[:, 1])
    num = 2.0 * prod_sum + smooth
    den = total_sum + smooth + eps
    return 1.0 - num / den


def dice_loss_ref(output, target, smooth=0.0, eps=1e-07):
    o = output.astype(jnp.float32)
    t = target.astype(jnp.float32)
    return 1.0 - (2.0 * jnp.sum(o * t) + smooth) / (jnp.sum(o) + jnp.sum(t) + smooth + eps)


if __name__ == "__main__":
    key = jax.random.PRNGKey(0)
    k1, k2 = jax.random.split(key)

    # Typical segmentation shapes: (batch, channels, H, W) in NCHW.
    shape = (2, 4, 16, 16)
    output = jax.nn.sigmoid(jax.random.normal(k1, shape, dtype=jnp.float32))
    target = (jax.random.uniform(k2, shape) > 0.5).astype(jnp.float32)

    loss = dice_loss(output, target, smooth=0.0, eps=1e-07)
    loss = jax.block_until_ready(loss)

    ref = dice_loss_ref(output, target, smooth=0.0, eps=1e-07)
    assert jnp.allclose(loss, ref, rtol=1e-5, atol=1e-6), (loss, ref)

    print("KERNEL_OK")
</pallas_src>

<mosaic_0001>
module attributes {stable_mosaic.version = 11 : i64} {
  func.func @_dice_kernel(%arg0: i32, %arg1: i32, %arg2: memref<16x128xf32, #tpu.memory_space<vmem>>, %arg3: memref<16x128xf32, #tpu.memory_space<vmem>>, %arg4: memref<1x2x8x128xf32, #tpu.memory_space<vmem>>) attributes {dimension_semantics = [#tpu.dimension_semantics<parallel>, #tpu.dimension_semantics<arbitrary>], iteration_bounds = array<i64: 2, 1>, scalar_prefetch = 0 : i64, scratch_operands = 0 : i64, tpu.core_type = #tpu.core_type<tc>, window_params = [{transform_indices = @transform_0, window_bounds = array<i64: 16, 128>}, {transform_indices = @transform_1, window_bounds = array<i64: 16, 128>}, {transform_indices = @transform_2, window_bounds = array<i64: 1, 2, 8, 128>}]} {
    %c0_i32 = arith.constant 0 : i32
    %0 = arith.cmpi eq, %arg1, %c0_i32 : i32
    %1 = arith.extui %0 : i1 to i32
    %c0_i32_0 = arith.constant 0 : i32
    %2 = arith.cmpi ne, %1, %c0_i32_0 : i32
    scf.if %2 {
      %cst_23 = arith.constant 0.000000e+00 : f32
      %35 = vector.broadcast %cst_23 : f32 to vector<2x8x128xf32>
      %c0_24 = arith.constant 0 : index
      %c0_25 = arith.constant 0 : index
      %c0_26 = arith.constant 0 : index
      %c0_27 = arith.constant 0 : index
      %36 = vector.load %arg4[%c0_24, %c0_25, %c0_26, %c0_27] : memref<1x2x8x128xf32, #tpu.memory_space<vmem>>, vector<1x2x8x128xf32>
      %37 = vector.shape_cast %36 : vector<1x2x8x128xf32> to vector<2x8x128xf32>
      %38 = vector.shape_cast %35 : vector<2x8x128xf32> to vector<1x2x8x128xf32>
      tpu.vector_store %arg4[%c0_24, %c0_25, %c0_26, %c0_27], %38 {strides = array<i32>} : memref<1x2x8x128xf32, #tpu.memory_space<vmem>>, vector<1x2x8x128xf32>,
    } else {
    }
    %c0 = arith.constant 0 : index
    %c0_1 = arith.constant 0 : index
    %3 = vector.load %arg2[%c0, %c0_1] : memref<16x128xf32, #tpu.memory_space<vmem>>, vector<16x128xf32>
    %c0_2 = arith.constant 0 : index
    %c0_3 = arith.constant 0 : index
    %4 = vector.load %arg3[%c0_2, %c0_3] : memref<16x128xf32, #tpu.memory_space<vmem>>, vector<16x128xf32>
    %c1_i32 = arith.constant 1 : i32
    %5 = arith.muli %arg0, %c1_i32 : i32
    %6 = arith.addi %5, %arg1 : i32
    %c16_i32 = arith.constant 16 : i32
    %7 = arith.muli %6, %c16_i32 : i32
    %8 = tpu.iota {dimensions = array<i32: 0>} : vector<16x128xi32>
    %9 = vector.broadcast %7 : i32 to vector<16x128xi32>
    %10 = arith.addi %9, %8 : vector<16x128xi32>
    %c16_i32_4 = arith.constant 16 : i32
    %11 = vector.broadcast %c16_i32_4 : i32 to vector<16x128xi32>
    %12 = arith.cmpi slt, %10, %11 : vector<16x128xi32>
    %cst = arith.constant 0.000000e+00 : f32
    %13 = vector.broadcast %cst : f32 to vector<16x128xf32>
    %14 = arith.select %12, %3, %13 : vector<16x128xi1>, vector<16x128xf32>
    %cst_5 = arith.constant 0.000000e+00 : f32
    %15 = vector.broadcast %cst_5 : f32 to vector<16x128xf32>
    %16 = arith.select %12, %4, %15 : vector<16x128xi1>, vector<16x128xf32>
    %17 = arith.mulf %14, %16 : vector<16x128xf32>
    %18 = vector.shape_cast %17 : vector<16x128xf32> to vector<2x8x128xf32>
    %cst_6 = arith.constant dense<0.000000e+00> : vector<8x128xf32>
    %19 = vector.multi_reduction <add>, %18, %cst_6 [0] : vector<2x8x128xf32> to vector<8x128xf32>
    %20 = arith.addf %14, %16 : vector<16x128xf32>
    %21 = vector.shape_cast %20 : vector<16x128xf32> to vector<2x8x128xf32>
    %cst_7 = arith.constant dense<0.000000e+00> : vector<8x128xf32>
    %22 = vector.multi_reduction <add>, %21, %cst_7 [0] : vector<2x8x128xf32> to vector<8x128xf32>
    %c0_8 = arith.constant 0 : index
    %c0_9 = arith.constant 0 : index
    %c0_10 = arith.constant 0 : index
    %c0_11 = arith.constant 0 : index
    %23 = vector.load %arg4[%c0_8, %c0_9, %c0_10, %c0_11] : memref<1x2x8x128xf32, #tpu.memory_space<vmem>>, vector<1x1x8x128xf32>
    %24 = vector.shape_cast %23 : vector<1x1x8x128xf32> to vector<8x128xf32>
    %25 = arith.addf %24, %19 : vector<8x128xf32>
    %c0_12 = arith.constant 0 : index
    %c0_13 = arith.constant 0 : index
    %c0_14 = arith.constant 0 : index
    %c0_15 = arith.constant 0 : index
    %26 = vector.load %arg4[%c0_12, %c0_13, %c0_14, %c0_15] : memref<1x2x8x128xf32, #tpu.memory_space<vmem>>, vector<1x1x8x128xf32>
    %27 = vector.shape_cast %26 : vector<1x1x8x128xf32> to vector<8x128xf32>
    %28 = vector.shape_cast %25 : vector<8x128xf32> to vector<1x1x8x128xf32>
    tpu.vector_store %arg4[%c0_12, %c0_13, %c0_14, %c0_15], %28 {strides = array<i32>} : memref<1x2x8x128xf32, #tpu.memory_space<vmem>>, vector<1x1x8x128xf32>,
    %c0_16 = arith.constant 0 : index
    %c1 = arith.constant 1 : index
    %c0_17 = arith.constant 0 : index
    %c0_18 = arith.constant 0 : index
    %29 = vector.load %arg4[%c0_16, %c1, %c0_17, %c0_18] : memref<1x2x8x128xf32, #tpu.memory_space<vmem>>, vector<1x1x8x128xf32>
    %30 = vector.shape_cast %29 : vector<1x1x8x128xf32> to vector<8x128xf32>
    %31 = arith.addf %30, %22 : vector<8x128xf32>
    %c0_19 = arith.constant 0 : index
    %c1_20 = arith.constant 1 : index
    %c0_21 = arith.constant 0 : index
    %c0_22 = arith.constant 0 : index
    %32 = vector.load %arg4[%c0_19, %c1_20, %c0_21, %c0_22] : memref<1x2x8x128xf32, #tpu.memory_space<vmem>>, vector<1x1x8x128xf32>
    %33 = vector.shape_cast %32 : vector<1x1x8x128xf32> to vector<8x128xf32>
    %34 = vector.shape_cast %31 : vector<8x128xf32> to vector<1x1x8x128xf32>
    tpu.vector_store %arg4[%c0_19, %c1_20, %c0_21, %c0_22], %34 {strides = array<i32>} : memref<1x2x8x128xf32, #tpu.memory_space<vmem>>, vector<1x1x8x128xf32>,
    return
  }
  func.func @transform_0(%arg0: i32, %arg1: i32) -> (i32, i32) {
    %c1_i32 = arith.constant 1 : i32
    %0 = arith.muli %arg0, %c1_i32 : i32
    %1 = arith.addi %0, %arg1 : i32
    %c0_i32 = arith.constant 0 : i32
    %2 = arith.minsi %1, %c0_i32 : i32
    %c0_i32_0 = arith.constant 0 : i32
    %c0_i32_1 = arith.constant 0 : i32
    return %2, %c0_i32_0 : i32, i32
  }
  func.func @transform_1(%arg0: i32, %arg1: i32) -> (i32, i32) {
    %c1_i32 = arith.constant 1 : i32
    %0 = arith.muli %arg0, %c1_i32 : i32
    %1 = arith.addi %0, %arg1 : i32
    %c0_i32 = arith.constant 0 : i32
    %2 = arith.minsi %1, %c0_i32 : i32
    %c0_i32_0 = arith.constant 0 : i32
    %c0_i32_1 = arith.constant 0 : i32
    return %2, %c0_i32_0 : i32, i32
  }
  func.func @transform_2(%arg0: i32, %arg1: i32) -> (i32, i32, i32, i32) {
    %c0_i32 = arith.constant 0 : i32
    %c0_i32_0 = arith.constant 0 : i32
    %c0_i32_1 = arith.constant 0 : i32
    %c0_i32_2 = arith.constant 0 : i32
    return %arg0, %c0_i32, %c0_i32_0, %c0_i32_1 : i32, i32, i32, i32
  }
}

</mosaic_0001>

<bundles_post_ra>
// kernel: tpu_custom_call.1
= control target key start
LH: loop header
LB: loop body
LE: loop exit
PB: predicated region body
PF: predicated region fallthrough
CT: control target
= control target key end

     0   :  { %7 = vsyncpa [#allocation3], 0  ;;  %s918_s0 = inlined_call_operand.hbm [shape: f32[16,128], index: 0, kind: input, shape index: {}]   ;;  %s919_s1 = inlined_call_operand.hbm [shape: f32[16,128], index: 1, kind: input, shape index: {}]   ;;  %s920_s2 = inlined_call_operand.hbm [shape: f32[2,2,8,128], index: 2, kind: output, shape index: {}]  }
   0x1   :  { %9 = vsyncpa [#allocation3 + $0x1], 0 }
   0x2   :  { %10 = vsyncpa [#allocation6], 0 }
   0x3   :  { %12 = vsyncpa [#allocation6 + $0x1], 0 }
   0x4   :  { %13 = vsyncpa [#allocation4], 0 }
   0x5   :  { %15 = vsyncpa [#allocation4 + $0x1], 0  ;;  %s707_s9 = smov 0   ;;  %s709_s10 = smov 0  }
   0x6   :  { %s711_s11 = smov 0   ;;  %s713_s12 = smov 0  }
   0x7   :  { %s715_s13 = smov 0   ;;  %s717_s14 = smov 0  }
   0x8   :  { %s719_s15 = smov 0   ;;  %s721_s16 = smov 0  }
   0x9 LB: > { %s395_s17 = sadd.s32 4294967295, %s683_s16   ;;  %s396_s18 = sadd.s32 4294967294, %s683_s16   ;;  %s683_s16 = sphi %s721_s16, %s21_s16   ;;  %s679_s15 = sphi %s719_s15, %s939_s15   ;;  %s675_s14 = sphi %s717_s14, %s938_s14   ;;  %s671_s13 = sphi %s715_s13, %s908_s13   ;;  %s667_s12 = sphi %s713_s12, %s937_s12   ;;  %s663_s11 = sphi %s711_s11, %s936_s11   ;;  %s659_s10 = sphi %s709_s10, %s935_s10   ;;  %s655_s9 = sphi %s707_s9, %s934_s9  }
   0xa   : > { %s33_s19 = sadd.s32 1, %s679_s15  ;;  %p652_p1 = scmp.ne.s32.totalorder %s671_s13, 0 }
   0xb   : > { %p35_p0 = scmp.ge.s32.totalorder %s33_s19, 2  ;;  %p54_p2 = scmp.eq.s32.totalorder %s683_s16, 0 }
   0xc   : > { %p59_p3 = scmp.ne.s32.totalorder %s671_s13, %s667_s12  ;;  %p60_p5 = scmp.eq.s32.totalorder %s395_s17, 0 }
   0xd   : > { %s941_s19 = smov (%p35_p0, %s33_s19), 0  ;;  %p753_p4 = por %p652_p1, %p54_p2 }
   0xe   : > { %p757_p6 = por %p60_p5, %p59_p3  ;;  %s101_s22 = ssub.s32 %s679_s15, %s941_s19 }
   0xf   : > { %p102_p7 = scmp.eq.s32.totalorder %s101_s22, 0  ;;  %s104_s23 = sadd.s32 1, %s663_s11 }
  0x10   : > { %s924_s21 = scalar_select %p757_p6, 1, 0 }
  0x11   : > { %s765_s24 = scalar_select %p102_p7, %s663_s11, %s104_s23  }
  0x12   : > { %p114_p8 = scmp.ne.s32.totalorder %s663_s11, %s659_s10  ;;  %p115_p9 = scmp.eq.s32.totalorder %s395_s17, 1 }
  0x13   : > { %p120_p10 = scmp.ne.s32.totalorder %s659_s10, %s655_s9  ;;  %p121_p11 = scmp.eq.s32.totalorder %s396_s18, 1 }
  0x14   : > { %p771_p12 = por %p115_p9, %p114_p8  ;;  %p437_p1 = scmp.lt.s32.totalorder %s683_s16, 2 }
  0x15   : > { %p776_p0 = por %p121_p11, %p120_p10  ;;  %s685_s27 = smov [#allocation2]  }
  0x16   : > { %s925_s25 = scalar_select %p771_p12, 1, 0 }
  0x17   : > { %s926_s26 = scalar_select %p776_p0, 1, 0 }
  0x18   : > { %s155_s28 = sshll.u32 %s685_s27, 4  ;;  %p783_p2 = pnand %p437_p1, %p753_p4  ;;  %s156_s28 = int_to_ptr.vmem [resolvable:$true] %s155_s28 }
  0x19   : > { %s516_s4 = scalar_lea.hbm %s918_s0, 256 }
  0x1a   : > { %p517_p3 = scmp.ne.s32.totalorder %s918_s0, %s516_s4  ;;  %p518_p5 = pneg %p783_p2 }
  0x1b   : > { %p523_p8 = scmp.lt.u32.totalorder %s516_s4, %s516_s4  ;;  %p525_p9 = scmp.lt.u32.totalorder %s516_s4, %s918_s0 }
  0x1c   : > { %p519_p7 = pnand %p518_p5, %p517_p3 }
  0x1d   : > { %p526_p10 = por %p525_p9, %p523_p8 }
  0x1e   : > { %p520_p4 = pneg %p519_p7 }
  0x20   : > { %p527_p11 = pnand %p526_p10, %p520_p4 }
  0x22   : > { %530 = shalt.err (!%p527_p11)
}
  0x23   : > { %s531_s12 = scalar_lea.vmem %s156_s28, 256  ;;  %s538_s17 = scalar_lea.vmem %s156_s28, 512 }
  0x24   : > { %p532_p1 = scmp.ne.s32.totalorder %s156_s28, %s531_s12  ;;  %p539_p12 = scmp.lt.s32.totalorder %s156_s28, %s156_s28 }
  0x25   : > { %p540_p6 = scmp.lt.s32.totalorder %s538_s17, %s531_s12 }
  0x26   : > { %p534_p13 = pnand %p532_p1, %p518_p5 }
  0x27   : > { %p541_p3 = por %p540_p6, %p539_p12 }
  0x28   : > { %p535_p0 = pneg %p534_p13 }
  0x2a   : > { %p542_p7 = pnand %p541_p3, %p535_p0 }
  0x2c   : > { %545 = shalt.err (!%p542_p7)
}
  0x2d   : > { %s686_s18 = smov 128   ;;  %s687_s20 = smov 8  }
  0x2e   : > { %429 = dma.hbm_to_vmem [thread:$0]  (!%p783_p2), %s918_s0, 256, %s156_s28, [#allocation3], %s686_s18, %s686_s18, %s687_s20  }
  0x2f   : > { %p405_p13 = scmp.ge.s32.totalorder %s683_s16, 1  ;;  %p187_p4 = scmp.lt.s32.totalorder %s683_s16, 3 }
  0x30   : > { %s688_s30 = smov [#allocation5]   ;;  %s546_s6 = scalar_lea.hbm %s919_s1, 256 }
  0x31   : > { %p814_p8 = pnand %p405_p13, %p187_p4  ;;  %s179_s3 = sshll.u32 %s688_s30, 4  ;;  %s180_s3 = int_to_ptr.vmem [resolvable:$true] %s179_s3 }
  0x32   : > { %p547_p6 = scmp.ne.s32.totalorder %s919_s1, %s546_s6  ;;  %p553_p9 = scmp.lt.u32.totalorder %s546_s6, %s546_s6 }
  0x33   : > { %s928_s27 = scalar_select %p814_p8, 1, 0 }
  0x34   : > { %p549_p12 = pnand %p547_p6, %p518_p5  ;;  %p555_p10 = scmp.lt.u32.totalorder %s546_s6, %s919_s1 }
  0x36   : > { %p550_p0 = pneg %p549_p12  ;;  %p556_p11 = por %p555_p10, %p553_p9 }
  0x38   : > { %p557_p1 = pnand %p556_p11, %p550_p0 }
  0x3a   : > { %560 = shalt.err (!%p557_p1)
}
  0x3b   : > { %s561_s17 = scalar_lea.vmem %s180_s3, 256  ;;  %s568_s22 = scalar_lea.vmem %s180_s3, 512 }
  0x3c   : > { %p562_p3 = scmp.ne.s32.totalorder %s180_s3, %s561_s17  ;;  %p569_p4 = scmp.lt.s32.totalorder %s180_s3, %s180_s3 }
  0x3d   : > { %p570_p8 = scmp.lt.s32.totalorder %s568_s22, %s561_s17 }
  0x3e   : > { %p564_p7 = pnand %p562_p3, %p518_p5 }
  0x3f   : > { %p571_p6 = por %p570_p8, %p569_p4 }
  0x40   : > { %p565_p13 = pneg %p564_p7 }
  0x42   : > { %p572_p12 = pnand %p571_p6, %p565_p13 }
  0x44   : > { %575 = shalt.err (!%p572_p12)
}
  0x45   : > { %432 = dma.hbm_to_vmem [thread:$0]  (!%p783_p2), %s919_s1, 256, %s180_s3, [#allocation6], %s686_s18, %s686_s18, %s687_s20  }
  0x46   : > { %p929_p0 = scmp.ne.s32.totalorder %s928_s27, 0 }
  0x47   : > { %s193_s4 = sand.u32 (!%p929_p0), 1, %s671_s13   ;;  %p930_p5 = scmp.ne.s32.totalorder (!%p929_p0), %s924_s21, 0 }
  0x48   : > { %191 = sbr.rel (%p929_p0) target bundleno = 111 (0x6f), region = 28  ;;  %s406_s5 = sshll.u32 (!%p929_p0), %s193_s4, 4 }
  0x49   : > { %s194_s6 = scalar_lea.sflag (!%p929_p0), [#allocation3], %s193_s4  ;;  %s197_s7 = scalar_lea.vmem (!%p929_p0), [#allocation2], %s406_s5 }
  0x4f   : > { %641 = dma.done.wait (%p930_p5), %s194_s6, 256  }
  0x50   : > { %643 = vsyncadd (%p930_p5), %s194_s6, 4294967040  ;;  %s203_s29 = scalar_lea.sflag [#allocation6], %s193_s4  ;;  %s206_s8 = scalar_lea.vmem [#allocation5], %s406_s5 }
  0x51   : > { %645 = dma.done.wait (%p930_p5), %s203_s29, 256  }
  0x52   : > { %647 = vsyncadd (%p930_p5), %s203_s29, 4294967040  ;;  %s409_s18 = sshll.u32 %s675_s14, 4  ;;  %v252_v0 = vlaneseq  ;;  %s229_s20 = sand.u32 1, %s659_s10   ;;  %v246_v6 = vld [vmem:[%s197_s7] sm:$0xff]  ;;  %v247_v7 = vld [vmem:[%s197_s7 + $0x8] sm:$0xff] }
  0x53   : > { %v255_v1 = vstv %s409_s18  ;;  %s408_s27 = sshll.u32 %s229_s20, 4  ;;  %v248_v8 = vld [vmem:[%s206_s8] sm:$0xff]  ;;  %v249_v9 = vld [vmem:[%s206_s8 + $0x8] sm:$0xff]  ;;  %s419_s21 = sshll.u32 %s675_s14, 8 }
  0x54   : > { %v253_v2 = vshrl.u32 %v252_v0, 7  ;;  %s231_s3 = scalar_lea.vmem [#allocation7], %s408_s27  ;;  %s860_s22 = scalar_lea.hbm %s920_s2, %s419_s21 }
  0x55   : > { %s291_s28 = sshll.u32 %s231_s3, 4  ;;  %s866_s23 = scalar_lea.sflag [#allocation4], %s229_s20  ;;  %s862_s28 = int_to_ptr.vmem [resolvable:$true] %s291_s28 }
  0x56   : > { %v254_v3 = vadd.s32 8, %v253_v2  ;;  %v256_v4 = vadd.s32 %v255_v1, %v253_v2  ;;  %s576_s14 = scalar_lea.vmem %s862_s28, 256  ;;  %p931_p8 = scmp.ne.s32.totalorder %s925_s25, 0 }
  0x57   : > { %p577_p2 = scmp.ne.s32.totalorder %s862_s28, %s576_s14  ;;  %s689_s30 = smov [#allocation7]  }
  0x58   : > { %v257_v5 = vadd.s32 %v255_v1, %v254_v3  ;;  %vm258_vm0 = vcmp.lt.s32.totalorder %v256_v4, 16  ;;  %s580_s4 = sshll.u32 %s689_s30, 4  ;;  %s581_s4 = int_to_ptr.vmem [resolvable:$false] %s580_s4 }
  0x59   : > { %v260_v10 = vsel %vm258_vm0, %v246_v6, 0.0  ;;  %v262_v11 = vsel %vm258_vm0, %v248_v8, 0.0  ;;  %p578_p9 = pnand %p577_p2, %p931_p8  ;;  %s582_s5 = scalar_lea.vmem %s581_s4, 512 }
  0x5a   : > { %vm259_vm1 = vcmp.lt.s32.totalorder %v257_v5, 16  ;;  %v264_v14 = vmul.f32 %v262_v11, %v260_v10  ;;  %v267_v15 = vadd.f32 %v262_v11, %v260_v10  ;;  %p583_p11 = scmp.lt.s32.totalorder %s862_s28, %s581_s4  ;;  %p584_p1 = scmp.lt.s32.totalorder %s582_s5, %s576_s14 }
  0x5b   : > { %v261_v12 = vsel %vm259_vm1, %v247_v7, 0.0  ;;  %v263_v13 = vsel %vm259_vm1, %v249_v9, 0.0  ;;  %p579_p10 = pneg %p578_p9 }
  0x5c   : > { %v265_v16 = vmul.f32 %v263_v13, %v261_v12  ;;  %v268_v17 = vadd.f32 %v263_v13, %v261_v12  ;;  %p585_p3 = por %p584_p1, %p583_p11 }
  0x5e   : > { %v266_v18 = vadd.f32 %v265_v16, %v264_v14  ;;  %v269_v19 = vadd.f32 %v268_v17, %v267_v15  ;;  %p586_p7 = pnand %p585_p3, %p579_p10 }
  0x60   : > { %272 = vst [vmem:[%s231_s3] sm:$0xff] %v266_v18  ;;  %411 = vst [vmem:[%s231_s3 + $0x8] sm:$0xff] %v269_v19 }
  0x61   : > { %589 = shalt.err (!%p586_p7)
}
  0x62   : > { %s590_s6 = scalar_lea.hbm %s860_s22, 256  ;;  %s594_s8 = scalar_lea.hbm %s920_s2, 512 }
  0x63   : > { %p591_p13 = scmp.ne.s32.totalorder %s860_s22, %s590_s6  ;;  %p595_p12 = scmp.lt.u32.totalorder %s860_s22, %s920_s2 }
  0x64   : > { %p596_p0 = scmp.lt.u32.totalorder %s594_s8, %s590_s6  ;;  %p598_p2 = scmp.lt.u32.totalorder %s590_s6, %s860_s22 }
  0x65   : > { %p592_p4 = pnand %p591_p13, %p931_p8 }
  0x66   : > { %p597_p5 = por %p596_p0, %p595_p12 }
  0x67   : > { %p593_p6 = pneg %p592_p4 }
  0x68   : > { %p599_p9 = por %p598_p2, %p597_p5 }
  0x6a   : > { %p600_p10 = pnand %p599_p9, %p593_p6 }
  0x6c   : > { %603 = shalt.err (!%p600_p10)
}
  0x6d   : > { %s690_s27 = smov 128   ;;  %s691_s21 = smov 8  }
  0x6e   : > { %424 = dma.vmem_to_hbm [thread:$0]  (%p931_p8), %s862_s28, 256, %s860_s22, %s866_s23, %s690_s27, %s690_s27, %s691_s21  }
  0x6f PF: > { %s306_s3 = sand.u32 1, %s655_s9   ;;  %p932_p11 = scmp.ne.s32.totalorder %s926_s26, 0 }
  0x70   : > { %p933_p1 = scmp.ge.s32.totalorder %s683_s16, 2  ;;  %s307_s12 = scalar_lea.sflag [#allocation4], %s306_s3 }
  0x72   : > { %p434_p3 = pnand %p933_p1, %p932_p11 }
  0x74   : > { %649 = dma.done.wait (!%p434_p3), %s307_s12, 256  }
  0x75   : > { %651 = vsyncadd (!%p434_p3), %s307_s12, 4294967040  ;;  %s21_s16 = sadd.s32 1, %s683_s16   ;;  %s934_s9 = smov %s659_s10 }
  0x76   : > { %p18_p7 = scmp.ge.s32.totalorder %s21_s16, 4   ;;  %s935_s10 = smov %s663_s11 }
  0x77   : > { %s936_s11 = smov %s765_s24  ;;  %s937_s12 = smov %s671_s13 }
  0x78   : > { %s908_s13 = smov 0   ;;  %s938_s14 = smov %s679_s15 }
  0x79   : > { %s939_s15 = smov %s941_s19  ;;  %20 = sbr.rel (!%p18_p7) target bundleno = 9 (0x9), region = 91 }
  0x80   :  { %312 = vsyncpa [#allocation3], 1 }
  0x81   :  { %314 = vsyncpa [#allocation3 + $0x1], 1 }
  0x82   :  { %315 = vsyncpa [#allocation6], 1 }
  0x83   :  { %317 = vsyncpa [#allocation6 + $0x1], 1 }
  0x84   :  { %318 = vsyncpa [#allocation4], 1 }
  0x85   :  { %320 = vsyncpa [#allocation4 + $0x1], 1 }

</bundles_post_ra>
